<compile_context>
chip_gen: v7x
topology: tpu7x:2x2x1
jax: 0.10.0
libtpu: 0.0.40
codegen_flags: <defaults>
</compile_context>

<pallas_src>
import functools

import jax
import jax.numpy as jnp
from jax import lax
from jax.experimental import pallas as pl
from jax.experimental.pallas import tpu as pltpu


# ---------------------------------------------------------------------------
# Kernel 1: all-modality encoder projection + L2 normalize, written directly into
#           the joint (N, M*D) embedding layout.  One grid step = one row tile,
#           all M modalities computed inside the step (weights stay VMEM-resident).
# TODO(synk): full PMF_Encoder (GCN over adj + transformer fusion) source was not
#             provided; the structure modality uses a dense per-entity feature table.
# ---------------------------------------------------------------------------
def _encode_joint_kernel(xg_ref, xr_ref, xa_ref, xi_ref,
                         wg_ref, wr_ref, wa_ref, wi_ref, o_ref):
    pairs = ((xg_ref, wg_ref), (xr_ref, wr_ref), (xa_ref, wa_ref), (xi_ref, wi_ref))
    D = wg_ref.shape[1]
    for m, (x_ref, w_ref) in enumerate(pairs):       # static unroll over 4 modalities
        x = x_ref[...].astype(jnp.bfloat16)          # [tm, Fin_m]
        w = w_ref[...].astype(jnp.bfloat16)          # [Fin_m, D]
        h = jnp.dot(x, w, preferred_element_type=jnp.float32)   # [tm, D] f32 accum
        ss = jnp.sum(h * h, axis=-1, keepdims=True)              # [tm, 1]
        # F.normalize(eps=1e-12) semantics: x / max(||x||, eps)
        o_ref[:, m * D:(m + 1) * D] = h * lax.rsqrt(jnp.maximum(ss, 1e-24))


def encode_to_joint(feats_list, weights_list, *, tm=512):
    """feats_list: M arrays [N, Fin_m]; weights_list: M arrays [Fin_m, D].
    Returns the joint embedding [N, M*D] whose column block m is the unit-L2-norm
    projection of modality m (== torch.cat of the F.normalize'd modal embeddings)."""
    M = len(feats_list)
    N = feats_list[0].shape[0]
    D = weights_list[0].shape[1]
    tm = min(tm, N)
    n_tiles = pl.cdiv(N, tm)   # no padding / tail slice: Pallas masks partial writes;
                               # garbage tail rows never reach HBM (rows independent).

    in_specs = [pl.BlockSpec((tm, x.shape[1]), lambda i: (i, 0)) for x in feats_list]
    in_specs += [pl.BlockSpec((w.shape[0], D), lambda i: (0, 0)) for w in weights_list]

    return pl.pallas_call(
        _encode_joint_kernel,
        out_shape=jax.ShapeDtypeStruct((N, M * D), jnp.float32),
        grid=(n_tiles,),
        in_specs=in_specs,
        out_specs=pl.BlockSpec((tm, M * D), lambda i: (i, 0)),
        compiler_params=pltpu.CompilerParams(dimension_semantics=("parallel",)),
    )(*feats_list, *weights_list)


# ---------------------------------------------------------------------------
# Kernel 2: batched CKG contrastive loss (bidirectional InfoNCE, temperature tau,
#           ab_weight alpha, per-pair loss mask), one modality per grid step.
# Operands arrive bf16 with 1/tau pre-folded into zis; all accumulation / lse math
# is f32; one exp pass shared by both directions via a global max (exp(sim-g) <= 1).
# TODO(synk): exact CKG_Loss source is not in the provided file; this implements the
#             standard MCLEA-style bidirectional InfoNCE with diagonal positives and
#             division by B (ambiguous whether the reference divides by B or sum(mask)).
# TODO(synk): for production batch sizes (B >~ 2k, joint D ~ 2k) this monolithic
#             [B, B] kernel should be row-tiled (flash-style online column lse) to
#             stay inside v7x's 64 MiB VMEM; on v6e raising vmem_limit_bytes suffices.
# ---------------------------------------------------------------------------
def _ckg_loss_kernel(zis_ref, zjs_ref, mrow_ref, mcol_ref, o_ref, *, alpha):
    zis = zis_ref[0]                         # [B, D] bf16, pre-scaled by 1/tau
    zjs = zjs_ref[0]                         # [B, D] bf16
    B = zis.shape[0]

    # single similarity matmul on the MXU (bf16 inputs, f32 accumulation)
    contract = (((1,), (1,)), ((), ()))      # contract feature dim, no batch dims
    sim = lax.dot_general(zis, zjs, contract,
                          preferred_element_type=jnp.float32)          # [B, B], has 1/tau

    # positive logits = diagonal of sim, computed directly as row dot products
    pos = jnp.sum(zis.astype(jnp.float32) * zjs.astype(jnp.float32),
                  axis=-1, keepdims=True)                              # [B, 1]

    # one exp pass shared by both softmax directions (global max -> exp <= 1)
    g = jnp.max(sim)
    e = jnp.exp(sim - g)                                               # [B, B]
    lse_r = g + jnp.log(jnp.sum(e, axis=1, keepdims=True))             # [B, 1] left->right
    lse_c = g + jnp.log(jnp.sum(e, axis=0, keepdims=True))             # [1, B] right->left

    mrow = mrow_ref[0]                       # [B, 1] fused mask (mask_i * mask_j)
    mcol = mcol_ref[0]                       # [1, B] same mask, lane layout

    # sum_b mask_b * (alpha*(lse_r_b - pos_b) + (1-alpha)*(lse_c_b - pos_b))
    term_r = alpha * jnp.sum(mrow * lse_r)
    term_c = (1.0 - alpha) * jnp.sum(mcol * lse_c)
    term_p = jnp.sum(mrow * pos)
    o_ref[0, 0] = (term_r + term_c - term_p) / B


def ckg_loss_batched(zis, zjs, mask, *, tau, alpha):
    """zis/zjs: [M, B, D] gathered embeddings; mask: [M, B] fused per-pair masks.
    Returns [M] scalar losses (one per modality / embedding set)."""
    M, B, D = zis.shape
    inv_tau = jnp.float32(1.0 / tau)
    # fold 1/tau into zis (BxD mul instead of BxB) and feed bf16 operands (half DMA).
    zis_s = (zis * inv_tau).astype(jnp.bfloat16)
    zjs_b = zjs.astype(jnp.bfloat16)
    mrow = mask[:, :, None].astype(jnp.float32)   # [M, B, 1]
    mcol = mask[:, None, :].astype(jnp.float32)   # [M, 1, B]
    kern = functools.partial(_ckg_loss_kernel, alpha=alpha)
    out = pl.pallas_call(
        kern,
        out_shape=jax.ShapeDtypeStruct((M, 1), jnp.float32),
        grid=(M,),
        in_specs=[
            pl.BlockSpec((1, B, D), lambda m: (m, 0, 0)),
            pl.BlockSpec((1, B, D), lambda m: (m, 0, 0)),
            pl.BlockSpec((1, B, 1), lambda m: (m, 0, 0)),
            pl.BlockSpec((1, 1, B), lambda m: (m, 0, 0)),
        ],
        # per-step SMEM output block -> modality axis is genuinely parallel (v7x megacore)
        out_specs=pl.BlockSpec((1, 1), lambda m: (m, 0),
                               memory_space=pltpu.MemorySpace.SMEM),
        compiler_params=pltpu.CompilerParams(dimension_semantics=("parallel",)),
    )(zis_s, zjs_b, mrow, mcol)
    return out[:, 0]


# ---------------------------------------------------------------------------
# CustomMultiLossLayer: uncertainty-weighted sum (tiny scalar glue, plain JAX).
# TODO(synk): exact CustomMultiLossLayer source not provided; standard Kendall
#             formulation sum_i exp(-log_var_i) * loss_i + log_var_i.
# ---------------------------------------------------------------------------
def multi_loss_layer(losses, log_vars):
    losses = jnp.asarray(losses)
    return jnp.sum(jnp.exp(-log_vars) * losses + log_vars)


# ---------------------------------------------------------------------------
# PMF.forward (args.use_surface=False -> 4 modalities; args.frozen=True -> masks used;
# cross_modal disabled -> cross_loss = 0; the modal_freezing step is a no-grad
# training-loop side effect and is not part of the differentiable forward).
# ---------------------------------------------------------------------------
def pmf_forward(params, feats, batch, loss_masks, *, tau, alpha):
    modal_keys = ("structure", "relation", "attribute", "image")
    w_names = ("w_gph", "w_rel", "w_att", "w_img")

    xs = [feats[k] for k in modal_keys]               # heterogeneous Fin allowed
    ws = [params[w] for w in w_names]
    D = ws[0].shape[1]

    # fused per-modal projection + normalize, written straight into the joint layout
    joint_emb = encode_and_view = encode_to_joint(xs, ws)          # [N, 4*D]

    # per-modal embeddings are lane-aligned column slices (D = 128 multiple)
    gph_emb = joint_emb[:, 0 * D:1 * D]
    rel_emb = joint_emb[:, 1 * D:2 * D]
    att_emb = joint_emb[:, 2 * D:3 * D]
    img_emb = joint_emb[:, 3 * D:4 * D]

    left = batch[:, 0]
    right = batch[:, 1]
    B = batch.shape[0]

    # one row-gather of the joint table serves both the joint and per-modal losses
    jl = joint_emb[left]                                           # [B, 4D]
    jr = joint_emb[right]                                          # [B, 4D]

    # --- joint contrastive loss (criterion_cl_joint, no mask)
    loss_joi = ckg_loss_batched(jl[None], jr[None],
                                jnp.ones((1, B), jnp.float32),
                                tau=tau, alpha=alpha)[0]

    # --- forward() re-normalizes the per-modal emb_dict values; the embeddings are
    #     already unit-L2-norm so F.normalize is an identity -> reuse directly.
    emb_dict = {
        "structure": gph_emb,
        "relation": rel_emb,
        "attribute": att_emb,
        "image": img_emb,
    }

    # --- inner_view_loss: 4 masked per-modal CKG losses in ONE batched launch
    zis_m = jnp.swapaxes(jl.reshape(B, 4, D), 0, 1)                # [4, B, D]
    zjs_m = jnp.swapaxes(jr.reshape(B, 4, D), 0, 1)                # [4, B, D]
    mask_stack = jnp.stack([loss_masks[k] for k in modal_keys], axis=0)  # [4, N]
    fused_mask = mask_stack[:, left] * mask_stack[:, right]             # [4, B]
    modal_losses = ckg_loss_batched(zis_m, zjs_m, fused_mask, tau=tau, alpha=alpha)  # [4]

    in_loss = multi_loss_layer(modal_losses, params["log_vars"])

    cross_loss = jnp.float32(0.0)
    loss_all = in_loss + loss_joi + cross_loss

    output = {
        "loss_dic": {
            "loss_all": loss_all,
            "joint_loss": loss_joi,
            "intra_modal_loss": in_loss,
            "cross_modal_loss": cross_loss,
            "gph_loss": modal_losses[0],
            "rel_loss": modal_losses[1],
            "att_loss": modal_losses[2],
            "img_loss": modal_losses[3],
        },
        "loss_all": loss_all,
        "gph_emb": gph_emb,
        "img_emb": img_emb,
        "rel_emb": rel_emb,
        "att_emb": att_emb,
        "name_emb": None,
        "char_emb": None,
        "joint_emb": joint_emb,
        "emb_dict_norm": emb_dict,
    }
    return loss_all, output


if __name__ == "__main__":
    key = jax.random.PRNGKey(0)
    ent_num, hidden_dim = 64, 128
    # heterogeneous per-modality input dims (image uses a wider feature) now supported
    modal_in_dims = {"structure": 128, "relation": 128, "attribute": 128, "image": 256}
    batch_pairs = 8

    keys = jax.random.split(key, 11)
    feats = {
        "structure": jax.random.normal(keys[0], (ent_num, modal_in_dims["structure"]), jnp.float32),
        "relation":  jax.random.normal(keys[1], (ent_num, modal_in_dims["relation"]),  jnp.float32),
        "attribute": jax.random.normal(keys[2], (ent_num, modal_in_dims["attribute"]), jnp.float32),
        "image":     jax.random.normal(keys[3], (ent_num, modal_in_dims["image"]),     jnp.float32),
    }
    params = {
        "w_gph": 0.02 * jax.random.normal(keys[4], (modal_in_dims["structure"], hidden_dim), jnp.float32),
        "w_rel": 0.02 * jax.random.normal(keys[5], (modal_in_dims["relation"],  hidden_dim), jnp.float32),
        "w_att": 0.02 * jax.random.normal(keys[6], (modal_in_dims["attribute"], hidden_dim), jnp.float32),
        "w_img": 0.02 * jax.random.normal(keys[7], (modal_in_dims["image"],     hidden_dim), jnp.float32),
        "log_vars": jnp.zeros((4,), jnp.float32),  # CustomMultiLossLayer(4) init
    }

    # aligned entity pairs for the batch (train_ill style: [B, 2] ids)
    left = jax.random.permutation(keys[8], ent_num)[:batch_pairs]
    right = jax.random.permutation(keys[9], ent_num)[:batch_pairs]
    batch = jnp.stack([left, right], axis=1).astype(jnp.int32)

    # loss masks (all ones; entities with missing images get frozen to 0)
    loss_masks = {k: jnp.ones((ent_num,), jnp.float32)
                  for k in ["structure", "relation", "attribute", "image"]}
    missing_img = jnp.array([3, 7], dtype=jnp.int32)
    loss_masks["image"] = loss_masks["image"].at[missing_img].set(0.0)

    loss_all, output = pmf_forward(params, feats, batch, loss_masks, tau=0.1, alpha=0.5)
    jax.block_until_ready(loss_all)
    jax.block_until_ready(output["joint_emb"])

    assert output["joint_emb"].shape == (ent_num, 4 * hidden_dim)
    assert output["gph_emb"].shape == (ent_num, hidden_dim)
    assert bool(jnp.isfinite(loss_all))
    print("KERNEL_OK")
</pallas_src>

<mosaic_0001>
module attributes {stable_mosaic.version = 11 : i64} {
  func.func @_encode_joint_kernel(%arg0: i32, %arg1: memref<64x128xf32, #tpu.memory_space<vmem>>, %arg2: memref<64x128xf32, #tpu.memory_space<vmem>>, %arg3: memref<64x128xf32, #tpu.memory_space<vmem>>, %arg4: memref<64x256xf32, #tpu.memory_space<vmem>>, %arg5: memref<128x128xf32, #tpu.memory_space<vmem>>, %arg6: memref<128x128xf32, #tpu.memory_space<vmem>>, %arg7: memref<128x128xf32, #tpu.memory_space<vmem>>, %arg8: memref<256x128xf32, #tpu.memory_space<vmem>>, %arg9: memref<64x512xf32, #tpu.memory_space<vmem>>) attributes {dimension_semantics = [#tpu.dimension_semantics<parallel>], iteration_bounds = array<i64: 1>, scalar_prefetch = 0 : i64, scratch_operands = 0 : i64, tpu.core_type = #tpu.core_type<tc>, window_params = [{transform_indices = @transform_0, window_bounds = array<i64: 64, 128>}, {transform_indices = @transform_1, window_bounds = array<i64: 64, 128>}, {transform_indices = @transform_2, window_bounds = array<i64: 64, 128>}, {transform_indices = @transform_3, window_bounds = array<i64: 64, 256>}, {pipeline_mode = #tpu.pipeline_mode<synchronous>, transform_indices = @transform_4, window_bounds = array<i64: 128, 128>}, {pipeline_mode = #tpu.pipeline_mode<synchronous>, transform_indices = @transform_5, window_bounds = array<i64: 128, 128>}, {pipeline_mode = #tpu.pipeline_mode<synchronous>, transform_indices = @transform_6, window_bounds = array<i64: 128, 128>}, {pipeline_mode = #tpu.pipeline_mode<synchronous>, transform_indices = @transform_7, window_bounds = array<i64: 256, 128>}, {transform_indices = @transform_8, window_bounds = array<i64: 64, 512>}]} {
    %c0 = arith.constant 0 : index
    %c0_0 = arith.constant 0 : index
    %0 = vector.load %arg1[%c0, %c0_0] : memref<64x128xf32, #tpu.memory_space<vmem>>, vector<64x128xf32>
    %1 = arith.truncf %0 : vector<64x128xf32> to vector<64x128xbf16>
    %c0_1 = arith.constant 0 : index
    %c0_2 = arith.constant 0 : index
    %2 = vector.load %arg5[%c0_1, %c0_2] : memref<128x128xf32, #tpu.memory_space<vmem>>, vector<128x128xf32>
    %3 = arith.truncf %2 : vector<128x128xf32> to vector<128x128xbf16>
    %cst = arith.constant dense<0.000000e+00> : vector<64x128xf32>
    %4 = tpu.matmul %1, %3, %cst {dimension_numbers = #tpu.dot_dimension_numbers<[1], [0], [0], [1], [0, 0, 1, 1], [], []>} : vector<64x128xbf16>, vector<128x128xbf16>, vector<64x128xf32> -> vector<64x128xf32>
    %5 = arith.mulf %4, %4 : vector<64x128xf32>
    %cst_3 = arith.constant dense<0.000000e+00> : vector<64xf32>
    %6 = vector.multi_reduction <add>, %5, %cst_3 [1] : vector<64x128xf32> to vector<64xf32>
    %7 = vector.shape_cast %6 : vector<64xf32> to vector<64x1xf32>
    %cst_4 = arith.constant 1.000000e-24 : f32
    %8 = vector.broadcast %cst_4 : f32 to vector<64x1xf32>
    %9 = arith.maximumf %7, %8 : vector<64x1xf32>
    %10 = math.rsqrt %9 : vector<64x1xf32>
    %11 = vector.broadcast %10 : vector<64x1xf32> to vector<64x128xf32>
    %12 = arith.mulf %4, %11 : vector<64x128xf32>
    %c0_5 = arith.constant 0 : index
    %c0_6 = arith.constant 0 : index
    %13 = vector.load %arg9[%c0_5, %c0_6] : memref<64x512xf32, #tpu.memory_space<vmem>>, vector<64x128xf32>
    tpu.vector_store %arg9[%c0_5, %c0_6], %12 {strides = array<i32>} : memref<64x512xf32, #tpu.memory_space<vmem>>, vector<64x128xf32>,
    %c0_7 = arith.constant 0 : index
    %c0_8 = arith.constant 0 : index
    %14 = vector.load %arg2[%c0_7, %c0_8] : memref<64x128xf32, #tpu.memory_space<vmem>>, vector<64x128xf32>
    %15 = arith.truncf %14 : vector<64x128xf32> to vector<64x128xbf16>
    %c0_9 = arith.constant 0 : index
    %c0_10 = arith.constant 0 : index
    %16 = vector.load %arg6[%c0_9, %c0_10] : memref<128x128xf32, #tpu.memory_space<vmem>>, vector<128x128xf32>
    %17 = arith.truncf %16 : vector<128x128xf32> to vector<128x128xbf16>
    %cst_11 = arith.constant dense<0.000000e+00> : vector<64x128xf32>
    %18 = tpu.matmul %15, %17, %cst_11 {dimension_numbers = #tpu.dot_dimension_numbers<[1], [0], [0], [1], [0, 0, 1, 1], [], []>} : vector<64x128xbf16>, vector<128x128xbf16>, vector<64x128xf32> -> vector<64x128xf32>
    %19 = arith.mulf %18, %18 : vector<64x128xf32>
    %cst_12 = arith.constant dense<0.000000e+00> : vector<64xf32>
    %20 = vector.multi_reduction <add>, %19, %cst_12 [1] : vector<64x128xf32> to vector<64xf32>
    %21 = vector.shape_cast %20 : vector<64xf32> to vector<64x1xf32>
    %cst_13 = arith.constant 1.000000e-24 : f32
    %22 = vector.broadcast %cst_13 : f32 to vector<64x1xf32>
    %23 = arith.maximumf %21, %22 : vector<64x1xf32>
    %24 = math.rsqrt %23 : vector<64x1xf32>
    %25 = vector.broadcast %24 : vector<64x1xf32> to vector<64x128xf32>
    %26 = arith.mulf %18, %25 : vector<64x128xf32>
    %c0_14 = arith.constant 0 : index
    %c128 = arith.constant 128 : index
    %27 = vector.load %arg9[%c0_14, %c128] : memref<64x512xf32, #tpu.memory_space<vmem>>, vector<64x128xf32>
    tpu.vector_store %arg9[%c0_14, %c128], %26 {strides = array<i32>} : memref<64x512xf32, #tpu.memory_space<vmem>>, vector<64x128xf32>,
    %c0_15 = arith.constant 0 : index
    %c0_16 = arith.constant 0 : index
    %28 = vector.load %arg3[%c0_15, %c0_16] : memref<64x128xf32, #tpu.memory_space<vmem>>, vector<64x128xf32>
    %29 = arith.truncf %28 : vector<64x128xf32> to vector<64x128xbf16>
    %c0_17 = arith.constant 0 : index
    %c0_18 = arith.constant 0 : index
    %30 = vector.load %arg7[%c0_17, %c0_18] : memref<128x128xf32, #tpu.memory_space<vmem>>, vector<128x128xf32>
    %31 = arith.truncf %30 : vector<128x128xf32> to vector<128x128xbf16>
    %cst_19 = arith.constant dense<0.000000e+00> : vector<64x128xf32>
    %32 = tpu.matmul %29, %31, %cst_19 {dimension_numbers = #tpu.dot_dimension_numbers<[1], [0], [0], [1], [0, 0, 1, 1], [], []>} : vector<64x128xbf16>, vector<128x128xbf16>, vector<64x128xf32> -> vector<64x128xf32>
    %33 = arith.mulf %32, %32 : vector<64x128xf32>
    %cst_20 = arith.constant dense<0.000000e+00> : vector<64xf32>
    %34 = vector.multi_reduction <add>, %33, %cst_20 [1] : vector<64x128xf32> to vector<64xf32>
    %35 = vector.shape_cast %34 : vector<64xf32> to vector<64x1xf32>
    %cst_21 = arith.constant 1.000000e-24 : f32
    %36 = vector.broadcast %cst_21 : f32 to vector<64x1xf32>
    %37 = arith.maximumf %35, %36 : vector<64x1xf32>
    %38 = math.rsqrt %37 : vector<64x1xf32>
    %39 = vector.broadcast %38 : vector<64x1xf32> to vector<64x128xf32>
    %40 = arith.mulf %32, %39 : vector<64x128xf32>
    %c0_22 = arith.constant 0 : index
    %c256 = arith.constant 256 : index
    %41 = vector.load %arg9[%c0_22, %c256] : memref<64x512xf32, #tpu.memory_space<vmem>>, vector<64x128xf32>
    tpu.vector_store %arg9[%c0_22, %c256], %40 {strides = array<i32>} : memref<64x512xf32, #tpu.memory_space<vmem>>, vector<64x128xf32>,
    %c0_23 = arith.constant 0 : index
    %c0_24 = arith.constant 0 : index
    %42 = vector.load %arg4[%c0_23, %c0_24] : memref<64x256xf32, #tpu.memory_space<vmem>>, vector<64x256xf32>
    %43 = arith.truncf %42 : vector<64x256xf32> to vector<64x256xbf16>
    %c0_25 = arith.constant 0 : index
    %c0_26 = arith.constant 0 : index
    %44 = vector.load %arg8[%c0_25, %c0_26] : memref<256x128xf32, #tpu.memory_space<vmem>>, vector<256x128xf32>
    %45 = arith.truncf %44 : vector<256x128xf32> to vector<256x128xbf16>
    %cst_27 = arith.constant dense<0.000000e+00> : vector<64x128xf32>
    %46 = tpu.matmul %43, %45, %cst_27 {dimension_numbers = #tpu.dot_dimension_numbers<[1], [0], [0], [1], [0, 0, 1, 1], [], []>} : vector<64x256xbf16>, vector<256x128xbf16>, vector<64x128xf32> -> vector<64x128xf32>
    %47 = arith.mulf %46, %46 : vector<64x128xf32>
    %cst_28 = arith.constant dense<0.000000e+00> : vector<64xf32>
    %48 = vector.multi_reduction <add>, %47, %cst_28 [1] : vector<64x128xf32> to vector<64xf32>
    %49 = vector.shape_cast %48 : vector<64xf32> to vector<64x1xf32>
    %cst_29 = arith.constant 1.000000e-24 : f32
    %50 = vector.broadcast %cst_29 : f32 to vector<64x1xf32>
    %51 = arith.maximumf %49, %50 : vector<64x1xf32>
    %52 = math.rsqrt %51 : vector<64x1xf32>
    %53 = vector.broadcast %52 : vector<64x1xf32> to vector<64x128xf32>
    %54 = arith.mulf %46, %53 : vector<64x128xf32>
    %c0_30 = arith.constant 0 : index
    %c384 = arith.constant 384 : index
    %55 = vector.load %arg9[%c0_30, %c384] : memref<64x512xf32, #tpu.memory_space<vmem>>, vector<64x128xf32>
    tpu.vector_store %arg9[%c0_30, %c384], %54 {strides = array<i32>} : memref<64x512xf32, #tpu.memory_space<vmem>>, vector<64x128xf32>,
    return
  }
  func.func @transform_0(%arg0: i32) -> (i32, i32) {
    %c0_i32 = arith.constant 0 : i32
    %c0_i32_0 = arith.constant 0 : i32
    return %arg0, %c0_i32 : i32, i32
  }
  func.func @transform_1(%arg0: i32) -> (i32, i32) {
    %c0_i32 = arith.constant 0 : i32
    %c0_i32_0 = arith.constant 0 : i32
    return %arg0, %c0_i32 : i32, i32
  }
  func.func @transform_2(%arg0: i32) -> (i32, i32) {
    %c0_i32 = arith.constant 0 : i32
    %c0_i32_0 = arith.constant 0 : i32
    return %arg0, %c0_i32 : i32, i32
  }
  func.func @transform_3(%arg0: i32) -> (i32, i32) {
    %c0_i32 = arith.constant 0 : i32
    %c0_i32_0 = arith.constant 0 : i32
    return %arg0, %c0_i32 : i32, i32
  }
  func.func @transform_4(%arg0: i32) -> (i32, i32) {
    %c0_i32 = arith.constant 0 : i32
    %c0_i32_0 = arith.constant 0 : i32
    %c0_i32_1 = arith.constant 0 : i32
    return %c0_i32, %c0_i32_0 : i32, i32
  }
  func.func @transform_5(%arg0: i32) -> (i32, i32) {
    %c0_i32 = arith.constant 0 : i32
    %c0_i32_0 = arith.constant 0 : i32
    %c0_i32_1 = arith.constant 0 : i32
    return %c0_i32, %c0_i32_0 : i32, i32
  }
  func.func @transform_6(%arg0: i32) -> (i32, i32) {
    %c0_i32 = arith.constant 0 : i32
    %c0_i32_0 = arith.constant 0 : i32
    %c0_i32_1 = arith.constant 0 : i32
    return %c0_i32, %c0_i32_0 : i32, i32
  }
  func.func @transform_7(%arg0: i32) -> (i32, i32) {
    %c0_i32 = arith.constant 0 : i32
    %c0_i32_0 = arith.constant 0 : i32
    %c0_i32_1 = arith.constant 0 : i32
    return %c0_i32, %c0_i32_0 : i32, i32
  }
  func.func @transform_8(%arg0: i32) -> (i32, i32) {
    %c0_i32 = arith.constant 0 : i32
    %c0_i32_0 = arith.constant 0 : i32
    return %arg0, %c0_i32 : i32, i32
  }
}

</mosaic_0001>

<bundles_post_ra>
// kernel: tpu_custom_call.1
= control target key start
LH: loop header
LB: loop body
LE: loop exit
PB: predicated region body
PF: predicated region fallthrough
CT: control target
= control target key end

     0   :  { %13 = vsyncpa [#allocation3], 0  ;;  %s1639_s0 = inlined_call_operand.hbm [shape: f32[64,128], index: 0, kind: input, shape index: {}]   ;;  %s1640_s1 = inlined_call_operand.hbm [shape: f32[64,128], index: 1, kind: input, shape index: {}]   ;;  %s1641_s2 = inlined_call_operand.hbm [shape: f32[64,128], index: 2, kind: input, shape index: {}]   ;;  %s1642_s3 = inlined_call_operand.hbm [shape: f32[64,256], index: 3, kind: input, shape index: {}]   ;;  %s1643_s4 = inlined_call_operand.hbm [shape: f32[128,128], index: 4, kind: input, shape index: {}]   ;;  %s1644_s5 = inlined_call_operand.hbm [shape: f32[128,128], index: 5, kind: input, shape index: {}]   ;;  %s1645_s6 = inlined_call_operand.hbm [shape: f32[128,128], index: 6, kind: input, shape index: {}]   ;;  %s1646_s7 = inlined_call_operand.hbm [shape: f32[256,128], index: 7, kind: input, shape index: {}]   ;;  %s1647_s8 = inlined_call_operand.hbm [shape: f32[64,512], index: 8, kind: output, shape index: {}]  }
   0x1   :  { %14 = vsyncpa [#allocation6], 0 }
   0x2   :  { %15 = vsyncpa [#allocation9], 0 }
   0x3   :  { %16 = vsyncpa [#allocation12], 0 }
   0x4   :  { %17 = vsyncpa [#allocation15], 0 }
   0x5   :  { %18 = vsyncpa [#allocation4], 0  ;;  %s1262_s27 = smov [#allocation5]   ;;  %s1263_s29 = smov [#allocation8]  }
   0x6   :  { %s36_s28 = sshll.u32 %s1262_s27, 4  ;;  %s60_s30 = sshll.u32 %s1263_s29, 4  ;;  %s37_s28 = int_to_ptr.vmem [resolvable:$true] %s36_s28  ;;  %s1322_s30 = int_to_ptr.vmem [resolvable:$true] %s60_s30 }
   0x7   :  { %s1052_s11 = scalar_lea.hbm %s1640_s1, 1024 }
   0x8   :  { %p1053_p0 = scmp.ne.s32.totalorder %s1640_s1, %s1052_s11  ;;  %p1056_p1 = scmp.lt.u32.totalorder %s1052_s11, %s1640_s1 }
   0xa   :  { %p1058_p2 = pnand %p1056_p1, %p1053_p0 }
   0xc   :  { %1061 = shalt.err (!%p1058_p2)
}
   0xd   :  { %s1062_s16 = scalar_lea.vmem %s37_s28, 1024  ;;  %p1067_p4 = scmp.lt.s32.totalorder %s37_s28, %s37_s28 }
   0xe   :  { %p1063_p3 = scmp.ne.s32.totalorder %s37_s28, %s1062_s16  ;;  %p1068_p5 = scmp.lt.s32.totalorder %s1062_s16, %s1062_s16 }
  0x10   :  { %p1069_p6 = por %p1068_p5, %p1067_p4 }
  0x12   :  { %p1070_p7 = pnand %p1069_p6, %p1063_p3 }
  0x14   :  { %1073 = shalt.err (!%p1070_p7)
}
  0x15   :  { %s1264_s17 = smov 128   ;;  %s1265_s18 = smov 8  }
  0x16   :  { %42 = dma.hbm_to_vmem [thread:$0]  %s1640_s1, 1024, %s37_s28, [#allocation6], %s1264_s17, %s1264_s17, %s1265_s18  }
  0x17   :  { %s1074_s23 = scalar_lea.hbm %s1642_s3, 2048 }
  0x18   :  { %p1075_p8 = scmp.ne.s32.totalorder %s1642_s3, %s1074_s23  ;;  %p1078_p9 = scmp.lt.u32.totalorder %s1074_s23, %s1642_s3 }
  0x1a   :  { %p1080_p10 = pnand %p1078_p9, %p1075_p8 }
  0x1c   :  { %1083 = shalt.err (!%p1080_p10)
}
  0x1d   :  { %s1084_s29 = scalar_lea.vmem %s1322_s30, 2048  ;;  %p1089_p12 = scmp.lt.s32.totalorder %s1322_s30, %s1322_s30 }
  0x1e   :  { %p1085_p11 = scmp.ne.s32.totalorder %s1322_s30, %s1084_s29  ;;  %p1090_p13 = scmp.lt.s32.totalorder %s1084_s29, %s1084_s29 }
  0x20   :  { %p1091_p0 = por %p1090_p13, %p1089_p12 }
  0x22   :  { %p1092_p1 = pnand %p1091_p0, %p1085_p11 }
  0x24   :  { %1095 = shalt.err (!%p1092_p1)
}
  0x25   :  { %s1266_s1 = smov 256   ;;  %s1267_s28 = smov 16  }
  0x26   :  { %66 = dma.hbm_to_vmem [thread:$0]  %s1642_s3, 2048, %s1322_s30, [#allocation9], %s1266_s1, %s1266_s1, %s1267_s28  }
  0x27   :  { %s1268_s11 = smov [#allocation11]   ;;  %s1269_s13 = smov [#allocation2]  }
  0x28   :  { %s84_s12 = sshll.u32 %s1268_s11, 4  ;;  %s24_s14 = sshll.u32 %s1269_s13, 4  ;;  %s85_s12 = int_to_ptr.vmem [resolvable:$true] %s84_s12  ;;  %s1356_s14 = int_to_ptr.vmem [resolvable:$true] %s24_s14 }
  0x29   :  { %s1096_s19 = scalar_lea.hbm %s1644_s5, 2048 }
  0x2a   :  { %p1097_p2 = scmp.ne.s32.totalorder %s1644_s5, %s1096_s19  ;;  %p1100_p3 = scmp.lt.u32.totalorder %s1096_s19, %s1644_s5 }
  0x2c   :  { %p1102_p4 = pnand %p1100_p3, %p1097_p2 }
  0x2e   :  { %1105 = shalt.err (!%p1102_p4)
}
  0x2f   :  { %s1106_s3 = scalar_lea.vmem %s85_s12, 2048  ;;  %p1111_p6 = scmp.lt.s32.totalorder %s85_s12, %s85_s12 }
  0x30   :  { %p1107_p5 = scmp.ne.s32.totalorder %s85_s12, %s1106_s3  ;;  %p1112_p7 = scmp.lt.s32.totalorder %s1106_s3, %s1106_s3 }
  0x32   :  { %p1113_p8 = por %p1112_p7, %p1111_p6 }
  0x34   :  { %p1114_p9 = pnand %p1113_p8, %p1107_p5 }
  0x36   :  { %1117 = shalt.err (!%p1114_p9)
}
  0x37   :  { %90 = dma.hbm_to_vmem [thread:$0]  %s1644_s5, 2048, %s85_s12, [#allocation12], %s1264_s17, %s1264_s17, %s1265_s18  }
  0x38   :  { %s1118_s27 = scalar_lea.hbm %s1639_s0, 1024 }
  0x39   :  { %p1119_p10 = scmp.ne.s32.totalorder %s1639_s0, %s1118_s27  ;;  %p1122_p11 = scmp.lt.u32.totalorder %s1118_s27, %s1639_s0 }
  0x3b   :  { %p1124_p12 = pnand %p1122_p11, %p1119_p10 }
  0x3d   :  { %1127 = shalt.err (!%p1124_p12)
}
  0x3e   :  { %s1128_s10 = scalar_lea.vmem %s1356_s14, 1024  ;;  %p1133_p0 = scmp.lt.s32.totalorder %s1356_s14, %s1356_s14 }
  0x3f   :  { %p1129_p13 = scmp.ne.s32.totalorder %s1356_s14, %s1128_s10  ;;  %p1134_p1 = scmp.lt.s32.totalorder %s1128_s10, %s1128_s10 }
  0x41   :  { %p1135_p2 = por %p1134_p1, %p1133_p0 }
  0x43   :  { %p1136_p3 = pnand %p1135_p2, %p1129_p13 }
  0x45   :  { %1139 = shalt.err (!%p1136_p3)
}
  0x46   :  { %30 = dma.hbm_to_vmem [thread:$0]  %s1639_s0, 1024, %s1356_s14, [#allocation3], %s1264_s17, %s1264_s17, %s1265_s18  }
  0x47   :  { %s1270_s12 = smov [#allocation7]   ;;  %s1271_s15 = smov [#allocation10]  }
  0x48   :  { %s48_s13 = sshll.u32 %s1270_s12, 4  ;;  %s72_s16 = sshll.u32 %s1271_s15, 4  ;;  %s49_s13 = int_to_ptr.vmem [resolvable:$true] %s48_s13  ;;  %s1393_s16 = int_to_ptr.vmem [resolvable:$true] %s72_s16 }
  0x49   :  { %s1140_s21 = scalar_lea.hbm %s1641_s2, 1024 }
  0x4a   :  { %p1141_p4 = scmp.ne.s32.totalorder %s1641_s2, %s1140_s21  ;;  %p1144_p5 = scmp.lt.u32.totalorder %s1140_s21, %s1641_s2 }
  0x4c   :  { %p1146_p6 = pnand %p1144_p5, %p1141_p4 }
  0x4e   :  { %1149 = shalt.err (!%p1146_p6)
}
  0x4f   :  { %s1150_s0 = scalar_lea.vmem %s49_s13, 1024  ;;  %p1155_p8 = scmp.lt.s32.totalorder %s49_s13, %s49_s13 }
  0x50   :  { %p1151_p7 = scmp.ne.s32.totalorder %s49_s13, %s1150_s0  ;;  %p1156_p9 = scmp.lt.s32.totalorder %s1150_s0, %s1150_s0 }
  0x52   :  { %p1157_p10 = por %p1156_p9, %p1155_p8 }
  0x54   :  { %p1158_p11 = pnand %p1157_p10, %p1151_p7 }
  0x56   :  { %1161 = shalt.err (!%p1158_p11)
}
  0x57   :  { %54 = dma.hbm_to_vmem [thread:$0]  %s1641_s2, 1024, %s49_s13, [#allocation6], %s1264_s17, %s1264_s17, %s1265_s18  }
  0x58   :  { %s1162_s27 = scalar_lea.hbm %s1643_s4, 2048 }
  0x59   :  { %p1163_p12 = scmp.ne.s32.totalorder %s1643_s4, %s1162_s27  ;;  %p1166_p13 = scmp.lt.u32.totalorder %s1162_s27, %s1643_s4 }
  0x5b   :  { %p1168_p0 = pnand %p1166_p13, %p1163_p12 }
  0x5d   :  { %1171 = shalt.err (!%p1168_p0)
}
  0x5e   :  { %s1172_s10 = scalar_lea.vmem %s1393_s16, 2048  ;;  %p1177_p2 = scmp.lt.s32.totalorder %s1393_s16, %s1393_s16 }
  0x5f   :  { %p1173_p1 = scmp.ne.s32.totalorder %s1393_s16, %s1172_s10  ;;  %p1178_p3 = scmp.lt.s32.totalorder %s1172_s10, %s1172_s10 }
  0x61   :  { %p1179_p4 = por %p1178_p3, %p1177_p2 }
  0x63   :  { %p1180_p5 = pnand %p1179_p4, %p1173_p1 }
  0x65   :  { %1183 = shalt.err (!%p1180_p5)
}
  0x66   :  { %78 = dma.hbm_to_vmem [thread:$0]  %s1643_s4, 2048, %s1393_s16, [#allocation9], %s1264_s17, %s1264_s17, %s1265_s18  }
  0x67   :  { %s1272_s11 = smov [#allocation13]   ;;  %s1273_s13 = smov [#allocation14]  }
  0x68   :  { %s96_s12 = sshll.u32 %s1272_s11, 4  ;;  %s108_s15 = sshll.u32 %s1273_s13, 4  ;;  %s97_s12 = int_to_ptr.vmem [resolvable:$true] %s96_s12  ;;  %s1430_s15 = int_to_ptr.vmem [resolvable:$true] %s108_s15 }
  0x69   :  { %s1184_s21 = scalar_lea.hbm %s1645_s6, 2048 }
  0x6a   :  { %p1185_p6 = scmp.ne.s32.totalorder %s1645_s6, %s1184_s21  ;;  %p1188_p7 = scmp.lt.u32.totalorder %s1184_s21, %s1645_s6 }
  0x6c   :  { %p1190_p8 = pnand %p1188_p7, %p1185_p6 }
  0x6e   :  { %1193 = shalt.err (!%p1190_p8)
}
  0x6f   :  { %s1194_s4 = scalar_lea.vmem %s97_s12, 2048  ;;  %p1199_p10 = scmp.lt.s32.totalorder %s97_s12, %s97_s12 }
  0x70   :  { %p1195_p9 = scmp.ne.s32.totalorder %s97_s12, %s1194_s4  ;;  %p1200_p11 = scmp.lt.s32.totalorder %s1194_s4, %s1194_s4 }
  0x72   :  { %p1201_p12 = por %p1200_p11, %p1199_p10 }
  0x74   :  { %p1202_p13 = pnand %p1201_p12, %p1195_p9 }
  0x76   :  { %1205 = shalt.err (!%p1202_p13)
}
  0x77   :  { %102 = dma.hbm_to_vmem [thread:$0]  %s1645_s6, 2048, %s97_s12, [#allocation12], %s1264_s17, %s1264_s17, %s1265_s18  }
  0x78   :  { %s1206_s25 = scalar_lea.hbm %s1646_s7, 4096 }
  0x79   :  { %p1207_p0 = scmp.ne.s32.totalorder %s1646_s7, %s1206_s25  ;;  %p1210_p1 = scmp.lt.u32.totalorder %s1206_s25, %s1646_s7 }
  0x7b   :  { %p1212_p2 = pnand %p1210_p1, %p1207_p0 }
  0x7d   :  { %1215 = shalt.err (!%p1212_p2)
}
  0x7e   :  { %s1216_s28 = scalar_lea.vmem %s1430_s15, 4096  ;;  %p1221_p4 = scmp.lt.s32.totalorder %s1430_s15, %s1430_s15 }
  0x7f   :  { %p1217_p3 = scmp.ne.s32.totalorder %s1430_s15, %s1216_s28  ;;  %p1222_p5 = scmp.lt.s32.totalorder %s1216_s28, %s1216_s28 }
  0x81   :  { %p1223_p6 = por %p1222_p5, %p1221_p4 }
  0x83   :  { %p1224_p7 = pnand %p1223_p6, %p1217_p3 }
  0x85   :  { %1227 = shalt.err (!%p1224_p7)
}
  0x86   :  { %114 = dma.hbm_to_vmem [thread:$0]  %s1646_s7, 4096, %s1430_s15, [#allocation15], %s1264_s17, %s1264_s17, %s1265_s18  }
  0x87   :  { %1250 = dma.done.wait [#allocation3], 1024  }
  0x88   :  { %1251 = vsyncadd [#allocation3], 4294966272 }
  0x89   :  { %1252 = dma.done.wait [#allocation6], 2048  }
  0x8a   :  { %1253 = vsyncadd [#allocation6], 4294965248 }
  0x8b   :  { %1254 = dma.done.wait [#allocation9], 4096  }
  0x8c   :  { %1255 = vsyncadd [#allocation9], 4294963200 }
  0x8d   :  { %1256 = dma.done.wait [#allocation12], 4096  }
  0x8e   :  { %1257 = vsyncadd [#allocation12], 4294963200 }
  0x8f   :  { %1258 = dma.done.wait [#allocation15], 4096  }
  0x90   :  { %1259 = vsyncadd [#allocation15], 4294963200  ;;  %v152_v0 = vld [vmem:[#allocation10] sm:$0xff]  ;;  %v153_v1 = vld [vmem:[#allocation10 + $0x8] sm:$0xff]  ;;  %s1274_s7 = smov [#allocation16]  }
  0x91   :  { %v309_v2 = vld [vmem:[#allocation11] sm:$0xff]  ;;  %v168_v3 = vpack.c.bf16 %v153_v1, %v152_v0  ;;  %v310_v4 = vld [vmem:[#allocation11 + $0x8] sm:$0xff]  ;;  %v154_v5 = vld [vmem:[#allocation10 + $0x10] sm:$0xff]  ;;  %s809_s17 = sshll.u32 %s1274_s7, 4  ;;  %s810_s17 = int_to_ptr.vmem [resolvable:$true] %s809_s17 }
  0x92   :  { %v155_v6 = vld [vmem:[#allocation10 + $0x18] sm:$0xff]  ;;  %v325_v7 = vpack.c.bf16 %v310_v4, %v309_v2  ;;  %v311_v9 = vld [vmem:[#allocation11 + $0x10] sm:$0xff]  ;;  %v156_v11 = vld [vmem:[#allocation10 + $0x20] sm:$0xff]  ;;  %s1228_s18 = scalar_lea.vmem %s810_s17, 4096  ;;  %p1233_p9 = scmp.lt.s32.totalorder %s810_s17, %s810_s17 }
  0x93   :  { %v169_v8 = vpack.c.bf16 %v155_v6, %v154_v5  ;;  %v312_v10 = vld [vmem:[#allocation11 + $0x18] sm:$0xff]  ;;  %901 = vmatprep.subr.bf16.mxu0 %v168_v3  ;;  %v157_v13 = vld [vmem:[#allocation10 + $0x28] sm:$0xff]  ;;  %v313_v14 = vld [vmem:[#allocation11 + $0x20] sm:$0xff]  ;;  %p1229_p8 = scmp.ne.s32.totalorder %s810_s17, %s1228_s18  ;;  %p1234_p10 = scmp.lt.s32.totalorder %s1228_s18, %s1228_s18 }
  0x94   :  { %v326_v12 = vpack.c.bf16 %v312_v10, %v311_v9  ;;  %v314_v15 = vld [vmem:[#allocation11 + $0x28] sm:$0xff]  ;;  %925 = vmatprep.subr.bf16.mxu1 %v325_v7  ;;  %902 = vmatpush3.bf16.msra.mxu0 %v168_v3  ;;  %v170_v16 = vpack.c.bf16 %v157_v13, %v156_v11  ;;  %v158_v18 = vld [vmem:[#allocation10 + $0x30] sm:$0xff]  ;;  %v159_v19 = vld [vmem:[#allocation10 + $0x38] sm:$0xff] }
  0x95   :  { %926 = vmatpush3.bf16.msra.mxu1 %v325_v7  ;;  %903 = vmatprep.subr.bf16.mxu0 %v169_v8  ;;  %v327_v17 = vpack.c.bf16 %v314_v15, %v313_v14  ;;  %v315_v20 = vld [vmem:[#allocation11 + $0x30] sm:$0xff]  ;;  %v316_v21 = vld [vmem:[#allocation11 + $0x38] sm:$0xff]  ;;  %v171_v22 = vpack.c.bf16 %v159_v19, %v158_v18  ;;  %v160_v23 = vld [vmem:[#allocation10 + $0x40] sm:$0xff]  ;;  %p1235_p11 = por %p1234_p10, %p1233_p9 }
  0x96   :  { %927 = vmatprep.subr.bf16.mxu1 %v326_v12  ;;  %v161_v24 = vld [vmem:[#allocation10 + $0x48] sm:$0xff]  ;;  %v328_v25 = vpack.c.bf16 %v316_v21, %v315_v20  ;;  %v317_v26 = vld [vmem:[#allocation11 + $0x40] sm:$0xff]  ;;  %v162_v36 = vld [vmem:[#allocation10 + $0x50] sm:$0xff] }
  0x97   :  { %v318_v27 = vld [vmem:[#allocation11 + $0x48] sm:$0xff]  ;;  %v140_v28 = vld [vmem:[#allocation2] sm:$0xff]  ;;  %v172_v34 = vpack.c.bf16 %v161_v24, %v160_v23  ;;  %v163_v37 = vld [vmem:[#allocation10 + $0x58] sm:$0xff]  ;;  %p1236_p12 = pnand %p1235_p11, %p1229_p8 }
  0x98   :  { %904 = vmatpush3.bf16.msra.mxu0 %v169_v8  ;;  %v141_v29 = vld [vmem:[#allocation2 + $0x8] sm:$0xff]  ;;  %v297_v30 = vld [vmem:[#allocation5] sm:$0xff]  ;;  %v329_v35 = vpack.c.bf16 %v318_v27, %v317_v26  ;;  %v319_v38 = vld [vmem:[#allocation11 + $0x50] sm:$0xff]  ;;  %v173_v40 = vpack.c.bf16 %v163_v37, %v162_v36 }
  0x99   :  { %928 = vmatpush3.bf16.msra.mxu1 %v326_v12  ;;  %905 = vmatprep.subr.bf16.mxu0 %v170_v16  ;;  %v298_v31 = vld [vmem:[#allocation5 + $0x8] sm:$0xff]  ;;  %v148_v32 = vpack.c.bf16 %v141_v29, %v140_v28  ;;  %v320_v39 = vld [vmem:[#allocation11 + $0x58] sm:$0xff]  ;;  %v164_v42 = vld [vmem:[#allocation10 + $0x60] sm:$0xff] }
  0x9a   :  { %929 = vmatprep.subr.bf16.mxu1 %v327_v17  ;;  %v305_v33 = vpack.c.bf16 %v298_v31, %v297_v30  ;;  %v330_v41 = vpack.c.bf16 %v320_v39, %v319_v38  ;;  %v165_v43 = vld [vmem:[#allocation10 + $0x68] sm:$0xff]  ;;  %v321_v44 = vld [vmem:[#allocation11 + $0x60] sm:$0xff]  ;;  %v166_v48 = vld [vmem:[#allocation10 + $0x70] sm:$0xff] }
  0x9b   :  { %917 = vmatprep.mubr.bf16.mxu0 %v148_v32  ;;  %v322_v45 = vld [vmem:[#allocation11 + $0x68] sm:$0xff]  ;;  %v174_v46 = vpack.c.bf16 %v165_v43, %v164_v42  ;;  %v167_v49 = vld [vmem:[#allocation10 + $0x78] sm:$0xff]  ;;  %v323_v50 = vld [vmem:[#allocation11 + $0x70] sm:$0xff] }
  0x9c   :  { %906 = vmatpush3.bf16.msra.mxu0 %v170_v16  ;;  %941 = vmatprep.mubr.bf16.mxu1 %v305_v33  ;;  %v331_v47 = vpack.c.bf16 %v322_v45, %v321_v44  ;;  %v324_v51 = vld [vmem:[#allocation11 + $0x78] sm:$0xff]  ;;  %v175_v52 = vpack.c.bf16 %v167_v49, %v166_v48  ;;  %v466_v54 = vld [vmem:[#allocation13] sm:$0xff]  ;;  %v467_v55 = vld [vmem:[#allocation13 + $0x8] sm:$0xff] }
  0x9d   :  { %930 = vmatpush3.bf16.msra.mxu1 %v327_v17  ;;  %907 = vmatprep.subr.bf16.mxu0 %v171_v22  ;;  %v332_v53 = vpack.c.bf16 %v324_v51, %v323_v50  ;;  %v651_v56 = vld [vmem:[#allocation14 + $0x80] sm:$0xff]  ;;  %v652_v57 = vld [vmem:[#allocation14 + $0x88] sm:$0xff]  ;;  %v142_v58 = vld [vmem:[#allocation2 + $0x10] sm:$0xff]  ;;  %v482_v62 = vpack.c.bf16 %v467_v55, %v466_v54 }
  0x9e   :  { %931 = vmatprep.subr.bf16.mxu1 %v328_v25  ;;  %v143_v59 = vld [vmem:[#allocation2 + $0x18] sm:$0xff]  ;;  %v299_v60 = vld [vmem:[#allocation5 + $0x10] sm:$0xff]  ;;  %v635_v63 = vld [vmem:[#allocation14] sm:$0xff]  ;;  %v675_v1 = vpack.c.bf16 %v652_v57, %v651_v56 }
  0x9f   :  { %v300_v61 = vld [vmem:[#allocation5 + $0x18] sm:$0xff]  ;;  %v636_v0 = vld [vmem:[#allocation14 + $0x8] sm:$0xff]  ;;  %v468_v2 = vld [vmem:[#allocation13 + $0x10] sm:$0xff]  ;;  %v149_v5 = vpack.c.bf16 %v143_v59, %v142_v58 }
  0xa0   :  { %908 = vmatpush3.bf16.msra.mxu0 %v171_v22  ;;  %v469_v3 = vld [vmem:[#allocation13 + $0x18] sm:$0xff]  ;;  %v653_v4 = vld [vmem:[#allocation14 + $0x90] sm:$0xff]  ;;  %v144_v7 = vld [vmem:[#allocation2 + $0x20] sm:$0xff]  ;;  %v306_v9 = vpack.c.bf16 %v300_v61, %v299_v60  ;;  %v667_v12 = vpack.c.bf16 %v636_v0, %v635_v63 }
  0xa1   :  { %932 = vmatpush3.bf16.msra.mxu1 %v328_v25  ;;  %909 = vmatprep.subr.bf16.mxu0 %v172_v34  ;;  %v654_v6 = vld [vmem:[#allocation14 + $0x98] sm:$0xff]  ;;  %v145_v8 = vld [vmem:[#allocation2 + $0x28] sm:$0xff]  ;;  %v301_v10 = vld [vmem:[#allocation5 + $0x20] sm:$0xff]  ;;  %v483_v13 = vpack.c.bf16 %v469_v3, %v468_v2 }
  0xa2   :  { %933 = vmatprep.subr.bf16.mxu1 %v329_v35  ;;  %v302_v11 = vld [vmem:[#allocation5 + $0x28] sm:$0xff]  ;;  %v637_v14 = vld [vmem:[#allocation14 + $0x10] sm:$0xff]  ;;  %v676_v15 = vpack.c.bf16 %v654_v6, %v653_v4  ;;  %v638_v16 = vld [vmem:[#allocation14 + $0x18] sm:$0xff]  ;;  %v150_v19 = vpack.c.bf16 %v145_v8, %v144_v7 }
  0xa3   :  { %v470_v17 = vld [vmem:[#allocation13 + $0x20] sm:$0xff]  ;;  %v471_v18 = vld [vmem:[#allocation13 + $0x28] sm:$0xff]  ;;  %v307_v22 = vpack.c.bf16 %v302_v11, %v301_v10  ;;  %v146_v24 = vld [vmem:[#allocation2 + $0x30] sm:$0xff]  ;;  %v668_v26 = vpack.c.bf16 %v638_v16, %v637_v14 }
  0xa4   :  { %910 = vmatpush3.bf16.msra.mxu0 %v172_v34  ;;  %v655_v20 = vld [vmem:[#allocation14 + $0xa0] sm:$0xff]  ;;  %v656_v21 = vld [vmem:[#allocation14 + $0xa8] sm:$0xff]  ;;  %v147_v25 = vld [vmem:[#allocation2 + $0x38] sm:$0xff]  ;;  %v484_v27 = vpack.c.bf16 %v471_v18, %v470_v17 }
  0xa5   :  { %934 = vmatpush3.bf16.msra.mxu1 %v329_v35  ;;  %911 = vmatprep.subr.bf16.mxu0 %v173_v40  ;;  %v639_v23 = vld [vmem:[#allocation14 + $0x20] sm:$0xff]  ;;  %v640_v28 = vld [vmem:[#allocation14 + $0x28] sm:$0xff]  ;;  %v303_v29 = vld [vmem:[#allocation5 + $0x30] sm:$0xff]  ;;  %v677_v31 = vpack.c.bf16 %v656_v21, %v655_v20  ;;  %v151_v36 = vpack.c.bf16 %v147_v25, %v146_v24 }
  0xa6   :  { %935 = vmatprep.subr.bf16.mxu1 %v330_v41  ;;  %v304_v30 = vld [vmem:[#allocation5 + $0x38] sm:$0xff]  ;;  %v472_v32 = vld [vmem:[#allocation13 + $0x30] sm:$0xff]  ;;  %v454_v37 = vld [vmem:[#allocation7] sm:$0xff]  ;;  %v669_v42 = vpack.c.bf16 %v640_v28, %v639_v23 }
  0xa7   :  { %v473_v33 = vld [vmem:[#allocation13 + $0x38] sm:$0xff]  ;;  %v657_v34 = vld [vmem:[#allocation14 + $0xb0] sm:$0xff]  ;;  %v455_v38 = vld [vmem:[#allocation7 + $0x8] sm:$0xff]  ;;  %v308_v39 = vpack.c.bf16 %v304_v30, %v303_v29 }
  0xa8   :  { %912 = vmatpush3.bf16.msra.mxu0 %v173_v40  ;;  %v658_v35 = vld [vmem:[#allocation14 + $0xb8] sm:$0xff]  ;;  %v612_v40 = vld [vmem:[#allocation8 + $0x8] sm:$0xff]  ;;  %v485_v43 = vpack.c.bf16 %v473_v33, %v472_v32  ;;  %v641_v44 = vld [vmem:[#allocation14 + $0x30] sm:$0xff]  ;;  %v462_v49 = vpack.c.bf16 %v455_v38, %v454_v37 }
  0xa9   :  { %936 = vmatpush3.bf16.msra.mxu1 %v330_v41  ;;  %913 = vmatprep.subr.bf16.mxu0 %v174_v46  ;;  %v614_v41 = vld [vmem:[#allocation8 + $0x18] sm:$0xff]  ;;  %v678_v45 = vpack.c.bf16 %v658_v35, %v657_v34  ;;  %v475_v48 = vld [vmem:[#allocation13 + $0x48] sm:$0xff]  ;;  %v659_v50 = vld [vmem:[#allocation14 + $0xc0] sm:$0xff] }
  0xaa   :  { %937 = vmatprep.subr.bf16.mxu1 %v331_v47  ;;  %v660_v51 = vld [vmem:[#allocation14 + $0xc8] sm:$0xff]  ;;  %v643_v55 = vld [vmem:[#allocation14 + $0x40] sm:$0xff]  ;;  %v476_v58 = vld [vmem:[#allocation13 + $0x50] sm:$0xff] }
  0xab   :  { %v679_v56 = vpack.c.bf16 %v660_v51, %v659_v50  ;;  %v644_v57 = vld [vmem:[#allocation14 + $0x48] sm:$0xff]  ;;  %v477_v59 = vld [vmem:[#allocation13 + $0x58] sm:$0xff]  ;;  %v661_v60 = vld [vmem:[#allocation14 + $0xd0] sm:$0xff] }
  0xac   :  { %914 = vmatpush3.bf16.msra.mxu0 %v174_v46  ;;  %v642_v46 = vld [vmem:[#allocation14 + $0x38] sm:$0xff]  ;;  %v487_v63 = vpack.c.bf16 %v477_v59, %v476_v58  ;;  %v645_v0 = vld [vmem:[#allocation14 + $0x50] sm:$0xff]  ;;  %v478_v3 = vld [vmem:[#allocation13 + $0x60] sm:$0xff] }
  0xad   :  { %938 = vmatpush3.bf16.msra.mxu1 %v331_v47  ;;  %915 = vmatprep.subr.bf16.mxu0 %v175_v52  ;;  %v474_v47 = vld [vmem:[#allocation13 + $0x40] sm:$0xff]  ;;  %v662_v61 = vld [vmem:[#allocation14 + $0xd8] sm:$0xff]  ;;  %v479_v4 = vld [vmem:[#allocation13 + $0x68] sm:$0xff] }
  0xae   :  { %939 = vmatprep.subr.bf16.mxu1 %v332_v53  ;;  %v486_v54 = vpack.c.bf16 %v475_v48, %v474_v47  ;;  %v646_v2 = vld [vmem:[#allocation14 + $0x58] sm:$0xff]  ;;  %v664_v6 = vld [vmem:[#allocation14 + $0xe8] sm:$0xff]  ;;  %v488_v8 = vpack.c.bf16 %v479_v4, %v478_v3  ;;  %v665_v14 = vld [vmem:[#allocation14 + $0xf0] sm:$0xff] }
  0xaf   :  { %v672_v7 = vpack.c.bf16 %v646_v2, %v645_v0  ;;  %v648_v11 = vld [vmem:[#allocation14 + $0x68] sm:$0xff]  ;;  %v650_v20 = vld [vmem:[#allocation14 + $0x78] sm:$0xff]  ;;  %v456_v21 = vld [vmem:[#allocation7 + $0x10] sm:$0xff] }
  0xb0   :  { %916 = vmatpush3.bf16.msra.mxu0 %v175_v52  ;;  %v628_v52 = vpack.c.bf16 %v614_v41, %v612_v40  ;;  %v611_v23 = vld [vmem:[#allocation8] sm:$0xff]  ;;  %v613_v25 = vld [vmem:[#allocation8 + $0x10] sm:$0xff]  ;;  %v616_v28 = vld [vmem:[#allocation8 + $0x28] sm:$0xff] }
  0xb1   :  { %940 = vmatpush3.bf16.msra.mxu1 %v332_v53  ;;  %949 = vmatprep.subr.bf16.mxu0 %v482_v62  ;;  %v670_v53 = vpack.c.bf16 %v642_v46, %v641_v44  ;;  %v618_v29 = vld [vmem:[#allocation8 + $0x38] sm:$0xff]  ;;  %v460_v34 = vld [vmem:[#allocation7 + $0x30] sm:$0xff]  ;;  %v620_v38 = vld [vmem:[#allocation8 + $0x48] sm:$0xff] }
  0xb2   :  { %861 = vmatprep.subr.bf16.mxu1 %v675_v1  ;;  %v680_v1 = vpack.c.bf16 %v662_v61, %v661_v60  ;;  %v630_v33 = vpack.c.bf16 %v618_v29, %v616_v28  ;;  %v461_v35 = vld [vmem:[#allocation7 + $0x38] sm:$0xff]  ;;  %v617_v37 = vld [vmem:[#allocation8 + $0x30] sm:$0xff] }
  0xb3   :  { %918 = vmatmul.mubr.bf16.vlgmr.msra.gmra.mrb[0].mxu0 %v149_v5  ;;  %v663_v5 = vld [vmem:[#allocation14 + $0xe0] sm:$0xff]  ;;  %v465_v40 = vpack.c.bf16 %v461_v35, %v460_v34  ;;  %v621_v44 = vld [vmem:[#allocation8 + $0x50] sm:$0xff]  ;;  %v626_v46 = vld [vmem:[#allocation8 + $0x78] sm:$0xff] }
  0xb4   :  { %942 = vmatmul.mubr.bf16.vlgmr.msra.gmra.mrb[0].mxu1 %v306_v9  ;;  %950 = vmatpush3.bf16.msra.mxu0 %v482_v62  ;;  %v671_v62 = vpack.c.bf16 %v644_v57, %v643_v55  ;;  %v647_v9 = vld [vmem:[#allocation14 + $0x60] sm:$0xff]  ;;  %v681_v10 = vpack.c.bf16 %v664_v6, %v663_v5  ;;  %v625_v50 = vld [vmem:[#allocation8 + $0x70] sm:$0xff] }
  0xb5   :  { %862 = vmatpush3.bf16.msra.mxu1 %v667_v12  ;;  %951 = vmatprep.subr.bf16.mxu0 %v483_v13  ;;  %v480_v12 = vld [vmem:[#allocation13 + $0x70] sm:$0xff]  ;;  %v673_v16 = vpack.c.bf16 %v648_v11, %v647_v9 }
  0xb6   :  { %863 = vmatprep.subr.bf16.mxu1 %v676_v15  ;;  %921 = vmatprep.mubr.bf16.mxu0 %v150_v19  ;;  %v666_v15 = vld [vmem:[#allocation14 + $0xf8] sm:$0xff]  ;;  %v649_v19 = vld [vmem:[#allocation14 + $0x70] sm:$0xff] }
  0xb7   :  { %945 = vmatprep.mubr.bf16.mxu1 %v307_v22  ;;  %v682_v18 = vpack.c.bf16 %v666_v15, %v665_v14  ;;  %v457_v22 = vld [vmem:[#allocation7 + $0x18] sm:$0xff]  ;;  %v674_v24 = vpack.c.bf16 %v650_v20, %v649_v19 }
  0xb8   :  { %952 = vmatpush3.bf16.msra.mxu0 %v483_v13  ;;  %v481_v13 = vld [vmem:[#allocation13 + $0x78] sm:$0xff]  ;;  %v463_v30 = vpack.c.bf16 %v457_v22, %v456_v21 }
  0xb9   :  { %864 = vmatpush3.bf16.msra.mxu1 %v668_v26  ;;  %953 = vmatprep.subr.bf16.mxu0 %v484_v27  ;;  %v489_v17 = vpack.c.bf16 %v481_v13, %v480_v12  ;;  %v458_v26 = vld [vmem:[#allocation7 + $0x20] sm:$0xff] }
  0xba   :  { %865 = vmatprep.subr.bf16.mxu1 %v677_v31  ;;  %v627_v31 = vpack.c.bf16 %v613_v25, %v611_v23 }
  0xbb   :  { %922 = vmatmul.mubr.bf16.gmra.mrb[4].mxu0 %v151_v36  ;;  %v615_v36 = vld [vmem:[#allocation8 + $0x20] sm:$0xff] }
  0xbc   :  { %954 = vmatpush3.bf16.msra.mxu0 %v484_v27  ;;  %946 = vmatmul.mubr.bf16.gmra.mrb[4].mxu1 %v308_v39  ;;  %v459_v27 = vld [vmem:[#allocation7 + $0x28] sm:$0xff]  ;;  %v622_v39 = vld [vmem:[#allocation8 + $0x58] sm:$0xff]  ;;  %v629_v41 = vpack.c.bf16 %v617_v37, %v615_v36 }
  0xbd   :  { %866 = vmatpush3.bf16.msra.mxu1 %v669_v42  ;;  %955 = vmatprep.subr.bf16.mxu0 %v485_v43  ;;  %v464_v32 = vpack.c.bf16 %v459_v27, %v458_v26  ;;  %v632_v42 = vpack.c.bf16 %v622_v39, %v620_v38 }
  0xbe   :  { %867 = vmatprep.subr.bf16.mxu1 %v678_v45  ;;  %965 = vmatprep.mubr.bf16.mxu0 %v462_v49  ;;  %v624_v45 = vld [vmem:[#allocation8 + $0x68] sm:$0xff]  ;;  %v623_v49 = vld [vmem:[#allocation8 + $0x60] sm:$0xff] }
  0xbf   :  { %715 = vmatprep.mubr.bf16.mxu1 %v628_v52  ;;  %v634_v48 = vpack.c.bf16 %v626_v46, %v624_v45  ;;  %v633_v51 = vpack.c.bf16 %v625_v50, %v623_v49 }
  0xc0   :  { %956 = vmatpush3.bf16.msra.mxu0 %v485_v43  ;;  %v619_v43 = vld [vmem:[#allocation8 + $0x40] sm:$0xff] }
  0xc1   :  { %868 = vmatpush3.bf16.msra.mxu1 %v670_v53  ;;  %957 = vmatprep.subr.bf16.mxu0 %v486_v54  ;;  %v631_v47 = vpack.c.bf16 %v621_v44, %v619_v43 }
  0xc2   :  { %869 = vmatprep.subr.bf16.mxu1 %v679_v56 }
  0xc4   :  { %958 = vmatpush3.bf16.msra.mxu0 %v486_v54 }
  0xc5   :  { %870 = vmatpush3.bf16.msra.mxu1 %v671_v62  ;;  %959 = vmatprep.subr.bf16.mxu0 %v487_v63 }
  0xc6   :  { %871 = vmatprep.subr.bf16.mxu1 %v680_v1 }
  0xc8   :  { %960 = vmatpush3.bf16.msra.mxu0 %v487_v63 }
  0xc9   :  { %872 = vmatpush3.bf16.msra.mxu1 %v672_v7  ;;  %961 = vmatprep.subr.bf16.mxu0 %v488_v8 }
  0xca   :  { %873 = vmatprep.subr.bf16.mxu1 %v681_v10 }
  0xcc   :  { %962 = vmatpush3.bf16.msra.mxu0 %v488_v8 }
  0xcd   :  { %874 = vmatpush3.bf16.msra.mxu1 %v673_v16  ;;  %963 = vmatprep.subr.bf16.mxu0 %v489_v17 }
  0xce   :  { %875 = vmatprep.subr.bf16.mxu1 %v682_v18 }
  0xd0   :  { %964 = vmatpush3.bf16.msra.mxu0 %v489_v17 }
  0xd1   :  { %876 = vmatpush3.bf16.msra.mxu1 %v674_v24 }
  0xd3   :  { %966 = vmatmul.mubr.bf16.vlgmr.msra.gmra.mrb[8].mxu0 %v463_v30 }
  0xd4   :  { %716 = vmatmul.mubr.bf16.vlgmr.msra.gmra.mrb[8].mxu1 %v627_v31  ;;  %969 = vmatprep.mubr.bf16.mxu0 %v464_v32 }
  0xd5   :  { %723 = vmatprep.mubr.bf16.mxu1 %v630_v33 }
  0xdb   :  { %970 = vmatmul.mubr.bf16.gmra.mrb[12].mxu0 %v465_v40 }
  0xdc   :  { %724 = vmatmul.mubr.bf16.gmra.mrb[12].mxu1 %v629_v41 }
  0xdd   :  { %731 = vmatprep.mubr.bf16.mxu1 %v632_v42 }
  0xe4   :  { %732 = vmatmul.mubr.bf16.gmra.mrb[16].mxu1 %v631_v47 }
  0xe5   :  { %739 = vmatprep.mubr.bf16.mxu1 %v634_v48 }
  0xec   :  { %740 = vmatmul.mubr.bf16.gmra.mrb[20].mxu1 %v633_v51 }
 0x186   :  { %v1467_v52 = vpop.f32.mrb[0].mxu0 }
 0x187   :  { %v1469_v53 = vpop.f32.mrb[0].mxu1  ;;  %v1471_v54 = vpop.f32.mrb[1].mxu0  ;;  %v243_v55 = vmul.f32 %v1467_v52, %v1467_v52 }
 0x188   :  { %v1475_v56 = vpop.f32.mrb[1].mxu1  ;;  %v1477_v57 = vpop.f32.mrb[2].mxu0  ;;  %v400_v58 = vmul.f32 %v1469_v53, %v1469_v53  ;;  %v241_v63 = vmul.f32 %v1471_v54, %v1471_v54 }
 0x189   :  { %v1481_v59 = vpop.f32.mrb[2].mxu1  ;;  %253 = vadd.xlane.f32.xlu1 %v243_v55  ;;  %v1483_v60 = vpop.f32.mrb[3].mxu0  ;;  %v244_v62 = vmul.f32 %v1477_v57, %v1477_v57  ;;  %v398_v4 = vmul.f32 %v1475_v56, %v1475_v56 }
 0x18a   :  { %410 = vadd.xlane.f32.xlu0 %v400_v58  ;;  %v1485_v61 = vpop.f32.mrb[3].mxu1  ;;  %v401_v1 = vmul.f32 %v1481_v59, %v1481_v59  ;;  %v242_v11 = vmul.f32 %v1483_v60, %v1483_v60 }
 0x18b   :  { %v399_v10 = vmul.f32 %v1485_v61, %v1485_v61 }
 0x18d   :  { %255 = vadd.xlane.f32.xlu1 %v244_v62 }
 0x18e   :  { %249 = vadd.xlane.f32.xlu0 %v241_v63  ;;  %v1491_v0 = vpop.f32.mrb[4].mxu0 }
 0x18f   :  { %v1495_v2 = vpop.f32.mrb[5].mxu0  ;;  %v1497_v3 = vpop.f32.mrb[4].mxu1  ;;  %v247_v13 = vmul.f32 %v1491_v0, %v1491_v0 }
 0x190   :  { %v1501_v5 = vpop.f32.mrb[6].mxu0  ;;  %v1503_v6 = vpop.f32.mrb[5].mxu1  ;;  %v404_v15 = vmul.f32 %v1497_v3, %v1497_v3  ;;  %v245_v17 = vmul.f32 %v1495_v2, %v1495_v2 }
 0x191   :  { %412 = vadd.xlane.f32.xlu1 %v401_v1  ;;  %v1505_v7 = vpop.f32.mrb[7].mxu0  ;;  %v1507_v8 = vpop.f32.mrb[6].mxu1  ;;  %v248_v12 = vmul.f32 %v1501_v5, %v1501_v5  ;;  %v402_v19 = vmul.f32 %v1503_v6, %v1503_v6 }
 0x192   :  { %406 = vadd.xlane.f32.xlu0 %v398_v4  ;;  %v1509_v9 = vpop.f32.mrb[7].mxu1  ;;  %v405_v14 = vmul.f32 %v1507_v8, %v1507_v8  ;;  %v246_v16 = vmul.f32 %v1505_v7, %v1505_v7 }
 0x193   :  { %v403_v18 = vmul.f32 %v1509_v9, %v1509_v9 }
 0x195   :  { %408 = vadd.xlane.f32.xlu1 %v399_v10 }
 0x196   :  { %251 = vadd.xlane.f32.xlu0 %v242_v11 }
 0x199   :  { %263 = vadd.xlane.f32.xlu1 %v248_v12 }
 0x19a   :  { %261 = vadd.xlane.f32.xlu0 %v247_v13 }
 0x19d   :  { %420 = vadd.xlane.f32.xlu1 %v405_v14 }
 0x19e   :  { %418 = vadd.xlane.f32.xlu0 %v404_v15 }
 0x1a1   :  { %259 = vadd.xlane.f32.xlu1 %v246_v16 }
 0x1a2   :  { %257 = vadd.xlane.f32.xlu0 %v245_v17 }
 0x1a5   :  { %416 = vadd.xlane.f32.xlu1 %v403_v18 }
 0x1a6   :  { %414 = vadd.xlane.f32.xlu0 %v402_v19  ;;  %v1531_v20 = vpop.f32.mrb[8].mxu0 }
 0x1a7   :  { %v877_v21 = vpop.f32.mrb[8].mxu1  ;;  %v1533_v22 = vpop.f32.mrb[9].mxu0  ;;  %v557_v23 = vmul.f32 %v1531_v20, %v1531_v20 }
 0x1a8   :  { %v878_v24 = vpop.f32.mrb[9].mxu1  ;;  %v1537_v25 = vpop.f32.mrb[10].mxu0  ;;  %v555_v32 = vmul.f32 %v1533_v22, %v1533_v22 }
 0x1a9   :  { %v1539_v26 = vadd.f32 %v878_v24, %v877_v21  ;;  %v880_v27 = vpop.f32.mrb[10].mxu1  ;;  %v1541_v28 = vpop.f32.mrb[11].mxu0  ;;  %v558_v29 = vmul.f32 %v1537_v25, %v1537_v25 }
 0x1aa   :  { %v881_v30 = vpop.f32.mrb[11].mxu1  ;;  %567 = vadd.xlane.f32.xlu0 %v557_v23  ;;  %v556_v33 = vmul.f32 %v1541_v28, %v1541_v28 }
 0x1ab   :  { %v1545_v31 = vadd.f32 %v881_v30, %v880_v27  ;;  %569 = vadd.xlane.f32.xlu1 %v558_v29  ;;  %v748_v38 = vmul.f32 %v1539_v26, %v1539_v26 }
 0x1ad   :  { %v749_v43 = vmul.f32 %v1545_v31, %v1545_v31 }
 0x1ae   :  { %563 = vadd.xlane.f32.xlu0 %v555_v32  ;;  %v1551_v34 = vpop.f32.mrb[12].mxu0 }
 0x1af   :  { %v883_v35 = vpop.f32.mrb[12].mxu1  ;;  %565 = vadd.xlane.f32.xlu1 %v556_v33  ;;  %v1553_v36 = vpop.f32.mrb[13].mxu0  ;;  %v561_v45 = vmul.f32 %v1551_v34, %v1551_v34 }
 0x1b0   :  { %v884_v37 = vpop.f32.mrb[13].mxu1  ;;  %v1557_v39 = vpop.f32.mrb[14].mxu0  ;;  %v559_v50 = vmul.f32 %v1553_v36, %v1553_v36 }
 0x1b1   :  { %v1559_v40 = vadd.f32 %v884_v37, %v883_v35  ;;  %v886_v41 = vpop.f32.mrb[14].mxu1  ;;  %v1561_v42 = vpop.f32.mrb[15].mxu0  ;;  %v562_v47 = vmul.f32 %v1557_v39, %v1557_v39 }
 0x1b2   :  { %v887_v44 = vpop.f32.mrb[15].mxu1  ;;  %756 = vadd.xlane.f32.xlu0 %v748_v38  ;;  %v560_v51 = vmul.f32 %v1561_v42, %v1561_v42 }
 0x1b3   :  { %v1567_v46 = vadd.f32 %v887_v44, %v886_v41  ;;  %758 = vadd.xlane.f32.xlu1 %v749_v43  ;;  %v750_v1 = vmul.f32 %v1559_v40, %v1559_v40 }
 0x1b5   :  { %v751_v4 = vmul.f32 %v1567_v46, %v1567_v46 }
 0x1b6   :  { %575 = vadd.xlane.f32.xlu0 %v561_v45 }
 0x1b7   :  { %v889_v48 = vpop.f32.mrb[16].mxu1  ;;  %577 = vadd.xlane.f32.xlu1 %v562_v47 }
 0x1b8   :  { %v890_v49 = vpop.f32.mrb[17].mxu1 }
 0x1b9   :  { %v1575_v55 = vadd.f32 %v890_v49, %v889_v48  ;;  %v892_v58 = vpop.f32.mrb[18].mxu1 }
 0x1ba   :  { %v893_v62 = vpop.f32.mrb[19].mxu1  ;;  %571 = vadd.xlane.f32.xlu0 %v559_v50 }
 0x1bb   :  { %v1577_v63 = vadd.f32 %v893_v62, %v892_v58  ;;  %573 = vadd.xlane.f32.xlu1 %v560_v51  ;;  %v752_v12 = vmul.f32 %v1575_v55, %v1575_v55 }
 0x1bd   :  { %v753_v15 = vmul.f32 %v1577_v63, %v1577_v63 }
 0x1be   :  { %760 = vadd.xlane.f32.xlu0 %v750_v1 }
 0x1bf   :  { %v895_v10 = vpop.f32.mrb[20].mxu1  ;;  %762 = vadd.xlane.f32.xlu1 %v751_v4 }
 0x1c0   :  { %v896_v11 = vpop.f32.mrb[21].mxu1 }
 0x1c1   :  { %v1585_v13 = vadd.f32 %v896_v11, %v895_v10  ;;  %v898_v14 = vpop.f32.mrb[22].mxu1 }
 0x1c2   :  { %v899_v16 = vpop.f32.mrb[23].mxu1  ;;  %764 = vadd.xlane.f32.xlu0 %v752_v12 }
 0x1c3   :  { %v1589_v17 = vadd.f32 %v899_v16, %v898_v14  ;;  %766 = vadd.xlane.f32.xlu1 %v753_v15  ;;  %v754_v18 = vmul.f32 %v1585_v13, %v1585_v13 }
 0x1c5   :  { %v755_v19 = vmul.f32 %v1589_v17, %v1589_v17 }
 0x1c6   :  { %768 = vadd.xlane.f32.xlu0 %v754_v18 }
 0x1c7   :  { %770 = vadd.xlane.f32.xlu1 %v755_v19 }
 0x216   :  { %v254_v21 = vpop.xlane.xlu1 %253 }
 0x217   :  { %v411_v23 = vpop.xlane.xlu0 %410  ;;  %v267_v24 = vmax.f32 %v254_v21, 1e-24 }
 0x218   :  { %v424_v27 = vmax.f32 %v411_v23, 1e-24 }
 0x219   :  { %988 = vrsqrt.f32 %v267_v24 }
 0x21a   :  { %990 = vrsqrt.f32 %v424_v27  ;;  %v256_v29 = vpop.xlane.xlu1 %255 }
 0x21b   :  { %v250_v30 = vpop.xlane.xlu0 %249  ;;  %v268_v32 = vmax.f32 %v256_v29, 1e-24 }
 0x21c   :  { %v265_v33 = vmax.f32 %v250_v30, 1e-24 }
 0x21d   :  { %992 = vrsqrt.f32 %v268_v32 }
 0x21e   :  { %994 = vrsqrt.f32 %v265_v33  ;;  %v413_v35 = vpop.xlane.xlu1 %412 }
 0x21f   :  { %v407_v37 = vpop.xlane.xlu0 %406  ;;  %v425_v38 = vmax.f32 %v413_v35, 1e-24 }
 0x220   :  { %v422_v41 = vmax.f32 %v407_v37, 1e-24 }
 0x221   :  { %996 = vrsqrt.f32 %v425_v38 }
 0x222   :  { %998 = vrsqrt.f32 %v422_v41  ;;  %v409_v43 = vpop.xlane.xlu1 %408 }
 0x223   :  { %v989_v44 = vpop.eup %988  ;;  %v423_v45 = vmax.f32 %v409_v43, 1e-24  ;;  %v252_v47 = vpop.xlane.xlu0 %251 }
 0x224   :  { %v991_v48 = vpop.eup %990  ;;  %v283_v49 = vmul.f32 %v989_v44, %v1467_v52  ;;  %v266_v50 = vmax.f32 %v252_v47, 1e-24 }
 0x225   :  { %v440_v51 = vmul.f32 %v991_v48, %v1469_v53  ;;  %1000 = vrsqrt.f32 %v423_v45 }
 0x226   :  { %291 = vst [vmem:[#allocation16 + $0x40] sm:$0xff] %v283_v49  ;;  %1002 = vrsqrt.f32 %v266_v50  ;;  %v264_v58 = vpop.xlane.xlu1 %263 }
 0x227   :  { %v993_v62 = vpop.eup %992  ;;  %448 = vst [vmem:[#allocation16 + $0x48] sm:$0xff] %v440_v51  ;;  %v262_v1 = vpop.xlane.xlu0 %261  ;;  %v272_v4 = vmax.f32 %v264_v58, 1e-24 }
 0x228   :  { %v995_v10 = vpop.eup %994  ;;  %v284_v11 = vmul.f32 %v993_v62, %v1477_v57  ;;  %v271_v12 = vmax.f32 %v262_v1, 1e-24 }
 0x229   :  { %v281_v14 = vmul.f32 %v995_v10, %v1471_v54  ;;  %1004 = vrsqrt.f32 %v272_v4 }
 0x22a   :  { %292 = vst [vmem:[#allocation16 + $0x60] sm:$0xff] %v284_v11  ;;  %1006 = vrsqrt.f32 %v271_v12  ;;  %v421_v52 = vpop.xlane.xlu1 %420 }
 0x22b   :  { %v997_v15 = vpop.eup %996  ;;  %289 = vst [vmem:[#allocation16] sm:$0xff] %v281_v14  ;;  %v419_v53 = vpop.xlane.xlu0 %418  ;;  %v429_v16 = vmax.f32 %v421_v52, 1e-24 }
 0x22c   :  { %v999_v18 = vpop.eup %998  ;;  %v441_v19 = vmul.f32 %v997_v15, %v1481_v59  ;;  %v428_v21 = vmax.f32 %v419_v53, 1e-24 }
 0x22d   :  { %v438_v23 = vmul.f32 %v999_v18, %v1475_v56  ;;  %1008 = vrsqrt.f32 %v429_v16 }
 0x22e   :  { %449 = vst [vmem:[#allocation16 + $0x68] sm:$0xff] %v441_v19  ;;  %1010 = vrsqrt.f32 %v428_v21  ;;  %v260_v57 = vpop.xlane.xlu1 %259 }
 0x22f   :  { %v1001_v24 = vpop.eup %1000  ;;  %446 = vst [vmem:[#allocation16 + $0x8] sm:$0xff] %v438_v23  ;;  %v258_v54 = vpop.xlane.xlu0 %257  ;;  %v270_v27 = vmax.f32 %v260_v57, 1e-24 }
 0x230   :  { %v1003_v29 = vpop.eup %1002  ;;  %v439_v30 = vmul.f32 %v1001_v24, %v1485_v61  ;;  %v269_v32 = vmax.f32 %v258_v54, 1e-24 }
 0x231   :  { %v282_v33 = vmul.f32 %v1003_v29, %v1483_v60  ;;  %1012 = vrsqrt.f32 %v270_v27 }
 0x232   :  { %447 = vst [vmem:[#allocation16 + $0x28] sm:$0xff] %v439_v30  ;;  %1014 = vrsqrt.f32 %v269_v32  ;;  %v417_v59 = vpop.xlane.xlu1 %416 }
 0x233   :  { %v1005_v35 = vpop.eup %1004  ;;  %290 = vst [vmem:[#allocation16 + $0x20] sm:$0xff] %v282_v33  ;;  %v415_v56 = vpop.xlane.xlu0 %414  ;;  %v427_v37 = vmax.f32 %v417_v59, 1e-24 }
 0x234   :  { %v1007_v38 = vpop.eup %1006  ;;  %v288_v41 = vmul.f32 %v1005_v35, %v1501_v5  ;;  %v426_v43 = vmax.f32 %v415_v56, 1e-24 }
 0x235   :  { %v287_v44 = vmul.f32 %v1007_v38, %v1491_v0  ;;  %1016 = vrsqrt.f32 %v427_v37 }
 0x236   :  { %296 = vst [vmem:[#allocation16 + $0xe0] sm:$0xff] %v288_v41  ;;  %1018 = vrsqrt.f32 %v426_v43 }
 0x237   :  { %v1009_v61 = vpop.eup %1008  ;;  %295 = vst [vmem:[#allocation16 + $0xc0] sm:$0xff] %v287_v44  ;;  %v568_v60 = vpop.xlane.xlu0 %567 }
 0x238   :  { %v1011_v45 = vpop.eup %1010  ;;  %v445_v47 = vmul.f32 %v1009_v61, %v1507_v8  ;;  %v581_v48 = vmax.f32 %v568_v60, 1e-24  ;;  %v570_v49 = vpop.xlane.xlu1 %569 }
 0x239   :  { %v444_v50 = vmul.f32 %v1011_v45, %v1497_v3  ;;  %v582_v51 = vmax.f32 %v570_v49, 1e-24 }
 0x23a   :  { %453 = vst [vmem:[#allocation16 + $0xe8] sm:$0xff] %v445_v47  ;;  %1020 = vrsqrt.f32 %v581_v48 }
 0x23b   :  { %v1013_v5 = vpop.eup %1012  ;;  %452 = vst [vmem:[#allocation16 + $0xc8] sm:$0xff] %v444_v50  ;;  %1022 = vrsqrt.f32 %v582_v51  ;;  %v564_v0 = vpop.xlane.xlu0 %563 }
 0x23c   :  { %v1015_v58 = vpop.eup %1014  ;;  %v286_v62 = vmul.f32 %v1013_v5, %v1505_v7  ;;  %v579_v1 = vmax.f32 %v564_v0, 1e-24  ;;  %v566_v4 = vpop.xlane.xlu1 %565 }
 0x23d   :  { %v285_v10 = vmul.f32 %v1015_v58, %v1495_v2  ;;  %v580_v11 = vmax.f32 %v566_v4, 1e-24 }
 0x23e   :  { %294 = vst [vmem:[#allocation16 + $0xa0] sm:$0xff] %v286_v62  ;;  %1024 = vrsqrt.f32 %v579_v1 }
 0x23f   :  { %v1017_v8 = vpop.eup %1016  ;;  %293 = vst [vmem:[#allocation16 + $0x80] sm:$0xff] %v285_v10  ;;  %1026 = vrsqrt.f32 %v580_v11  ;;  %v757_v3 = vpop.xlane.xlu0 %756 }
 0x240   :  { %v1019_v12 = vpop.eup %1018  ;;  %v443_v14 = vmul.f32 %v1017_v8, %v1509_v9  ;;  %v772_v52 = vmax.f32 %v757_v3, 1e-24  ;;  %v759_v15 = vpop.xlane.xlu1 %758 }
 0x241   :  { %v442_v53 = vmul.f32 %v1019_v12, %v1503_v6  ;;  %v773_v16 = vmax.f32 %v759_v15, 1e-24 }
 0x242   :  { %451 = vst [vmem:[#allocation16 + $0xa8] sm:$0xff] %v443_v14  ;;  %1028 = vrsqrt.f32 %v772_v52 }
 0x243   :  { %450 = vst [vmem:[#allocation16 + $0x88] sm:$0xff] %v442_v53  ;;  %1030 = vrsqrt.f32 %v773_v16  ;;  %v576_v2 = vpop.xlane.xlu0 %575 }
 0x244   :  { %v1021_v7 = vpop.eup %1020  ;;  %v585_v18 = vmax.f32 %v576_v2, 1e-24  ;;  %v578_v19 = vpop.xlane.xlu1 %577 }
 0x245   :  { %v1023_v21 = vpop.eup %1022  ;;  %v597_v23 = vmul.f32 %v1021_v7, %v1531_v20  ;;  %v586_v57 = vmax.f32 %v578_v19, 1e-24 }
 0x246   :  { %v598_v24 = vmul.f32 %v1023_v21, %v1537_v25  ;;  %1032 = vrsqrt.f32 %v585_v18 }
 0x247   :  { %605 = vst [vmem:[#allocation16 + $0x50] sm:$0xff] %v597_v23  ;;  %1034 = vrsqrt.f32 %v586_v57  ;;  %v572_v9 = vpop.xlane.xlu0 %571 }
 0x248   :  { %v1025_v6 = vpop.eup %1024  ;;  %606 = vst [vmem:[#allocation16 + $0x70] sm:$0xff] %v598_v24  ;;  %v583_v54 = vmax.f32 %v572_v9, 1e-24  ;;  %v574_v27 = vpop.xlane.xlu1 %573 }
 0x249   :  { %v1027_v29 = vpop.eup %1026  ;;  %v595_v30 = vmul.f32 %v1025_v6, %v1533_v22  ;;  %v584_v32 = vmax.f32 %v574_v27, 1e-24 }
 0x24a   :  { %v596_v33 = vmul.f32 %v1027_v29, %v1541_v28  ;;  %1036 = vrsqrt.f32 %v583_v54 }
 0x24b   :  { %603 = vst [vmem:[#allocation16 + $0x10] sm:$0xff] %v595_v30  ;;  %1038 = vrsqrt.f32 %v584_v32  ;;  %v761_v20 = vpop.xlane.xlu0 %760 }
 0x24c   :  { %v1029_v59 = vpop.eup %1028  ;;  %604 = vst [vmem:[#allocation16 + $0x30] sm:$0xff] %v596_v33  ;;  %v774_v25 = vmax.f32 %v761_v20, 1e-24  ;;  %v763_v35 = vpop.xlane.xlu1 %762 }
 0x24d   :  { %v1031_v56 = vpop.eup %1030  ;;  %v788_v37 = vmul.f32 %v1029_v59, %v1539_v26  ;;  %v775_v38 = vmax.f32 %v763_v35, 1e-24 }
 0x24e   :  { %v789_v41 = vmul.f32 %v1031_v56, %v1545_v31  ;;  %1040 = vrsqrt.f32 %v774_v25 }
 0x24f   :  { %796 = vst [vmem:[#allocation16 + $0x18] sm:$0xff] %v788_v37  ;;  %1042 = vrsqrt.f32 %v775_v38  ;;  %v765_v22 = vpop.xlane.xlu0 %764 }
 0x250   :  { %v1033_v43 = vpop.eup %1032  ;;  %797 = vst [vmem:[#allocation16 + $0x38] sm:$0xff] %v789_v41  ;;  %v776_v28 = vmax.f32 %v765_v22, 1e-24  ;;  %v767_v44 = vpop.xlane.xlu1 %766 }
 0x251   :  { %v1035_v61 = vpop.eup %1034  ;;  %v601_v60 = vmul.f32 %v1033_v43, %v1551_v34  ;;  %v777_v45 = vmax.f32 %v767_v44, 1e-24 }
 0x252   :  { %v602_v47 = vmul.f32 %v1035_v61, %v1557_v39  ;;  %1044 = vrsqrt.f32 %v776_v28 }
 0x253   :  { %609 = vst [vmem:[#allocation16 + $0xd0] sm:$0xff] %v601_v60  ;;  %1046 = vrsqrt.f32 %v777_v45  ;;  %v769_v26 = vpop.xlane.xlu0 %768 }
 0x254   :  { %v1037_v48 = vpop.eup %1036  ;;  %610 = vst [vmem:[#allocation16 + $0xf0] sm:$0xff] %v602_v47  ;;  %v778_v31 = vmax.f32 %v769_v26, 1e-24  ;;  %v771_v49 = vpop.xlane.xlu1 %770 }
 0x255   :  { %v1039_v50 = vpop.eup %1038  ;;  %v599_v51 = vmul.f32 %v1037_v48, %v1553_v36  ;;  %v779_v5 = vmax.f32 %v771_v49, 1e-24 }
 0x256   :  { %v600_v0 = vmul.f32 %v1039_v50, %v1561_v42  ;;  %1048 = vrsqrt.f32 %v778_v31 }
 0x257   :  { %607 = vst [vmem:[#allocation16 + $0x90] sm:$0xff] %v599_v51  ;;  %1050 = vrsqrt.f32 %v779_v5 }
 0x258   :  { %v1041_v34 = vpop.eup %1040  ;;  %608 = vst [vmem:[#allocation16 + $0xb0] sm:$0xff] %v600_v0 }
 0x259   :  { %v1043_v39 = vpop.eup %1042  ;;  %v790_v58 = vmul.f32 %v1041_v34, %v1559_v40 }
 0x25a   :  { %v791_v62 = vmul.f32 %v1043_v39, %v1567_v46 }
 0x25b   :  { %798 = vst [vmem:[#allocation16 + $0x58] sm:$0xff] %v790_v58 }
 0x25c   :  { %v1045_v1 = vpop.eup %1044  ;;  %799 = vst [vmem:[#allocation16 + $0x78] sm:$0xff] %v791_v62 }
 0x25d   :  { %v1047_v4 = vpop.eup %1046  ;;  %v792_v10 = vmul.f32 %v1045_v1, %v1575_v55 }
 0x25e   :  { %v793_v36 = vmul.f32 %v1047_v4, %v1577_v63 }
 0x25f   :  { %800 = vst [vmem:[#allocation16 + $0x98] sm:$0xff] %v792_v10 }
 0x260   :  { %v1049_v42 = vpop.eup %1048  ;;  %801 = vst [vmem:[#allocation16 + $0xb8] sm:$0xff] %v793_v36 }
 0x261   :  { %v1051_v11 = vpop.eup %1050  ;;  %v794_v8 = vmul.f32 %v1049_v42, %v1585_v13 }
 0x262   :  { %v795_v40 = vmul.f32 %v1051_v11, %v1589_v17 }
 0x263   :  { %802 = vst [vmem:[#allocation16 + $0xd8] sm:$0xff] %v794_v8 }
 0x264   :  { %803 = vst [vmem:[#allocation16 + $0xf8] sm:$0xff] %v795_v40 }
 0x265   :  { %1239 = shalt.err (!%p1236_p12)
}
 0x266   :  { %s1240_s5 = scalar_lea.hbm %s1647_s8, 4096 }
 0x267   :  { %p1241_p13 = scmp.ne.s32.totalorder %s1647_s8, %s1240_s5  ;;  %p1244_p0 = scmp.lt.u32.totalorder %s1240_s5, %s1647_s8 }
 0x269   :  { %p1246_p1 = pnand %p1244_p0, %p1241_p13 }
 0x26b   :  { %1249 = shalt.err (!%p1246_p1)
}
 0x26c   :  { %s1275_s19 = smov 512   ;;  %s1276_s20 = smov 32  }
 0x26d   :  { %815 = dma.vmem_to_hbm [thread:$0]  %s810_s17, 4096, %s1647_s8, [#allocation4], %s1275_s19, %s1275_s19, %s1276_s20  }
 0x26e   :  { %1260 = dma.done.wait [#allocation4], 4096  }
 0x26f   :  { %1261 = vsyncadd [#allocation4], 4294963200 }
 0x270   :  { %819 = vsyncpa [#allocation3], 1 }
 0x271   :  { %820 = vsyncpa [#allocation6], 1 }
 0x272   :  { %821 = vsyncpa [#allocation9], 1 }
 0x273   :  { %822 = vsyncpa [#allocation12], 1 }
 0x274   :  { %823 = vsyncpa [#allocation15], 1 }
 0x275   :  { %824 = vsyncpa [#allocation4], 1 }

</bundles_post_ra>
